<compile_context>
chip_gen: v5e
topology: v5e:2x2
jax: 0.10.0
libtpu: 0.0.40
codegen_flags: <defaults>
</compile_context>

<pallas_src>
import jax
import jax.numpy as jnp
from jax.experimental import pallas as pl
from jax.experimental.pallas import tpu as pltpu


# ----------------------------------------------------------------------------
# helper mirrored from the PyTorch file
# ----------------------------------------------------------------------------
def make_divisible(v, divisor, min_val=None):
    if min_val is None:
        min_val = divisor
    new_v = max(min_val, int(v + divisor / 2) // divisor * divisor)
    if new_v < 0.9 * v:
        new_v += divisor
    return new_v


# ----------------------------------------------------------------------------
# fused SE kernel: pool + fc(reduce) + relu + fc(expand) + h_sigmoid + scale
# ----------------------------------------------------------------------------
def _se_kernel(x_ref, w1t_ref, b1_ref, w2t_ref, b2_ref, o_ref):
    # Whole problem lives in VMEM; single invocation (no grid).
    x = x_ref[...].astype(jnp.float32)                       # (N, C, HW) lane-dense

    # Global average pool over the spatial (lane) axis -> (N, C):
    # batch on sublanes, channels on lanes (lane-dense for the FCs below).
    pooled = jnp.mean(x, axis=-1)                             # (N, C)

    # Squeeze: (N, C) @ (C, Cmid) + (1, Cmid), relu.  One tiny MXU push for all batches.
    mid = jnp.dot(pooled, w1t_ref[...].astype(jnp.float32),
                  preferred_element_type=jnp.float32)
    mid = jnp.maximum(mid + b1_ref[...].astype(jnp.float32), 0.0)   # (N, Cmid)

    # Excite: (N, Cmid) @ (Cmid, C) + (1, C), h_sigmoid = relu6(y+3)/6.
    y = jnp.dot(mid, w2t_ref[...].astype(jnp.float32),
                preferred_element_type=jnp.float32)
    y = y + b2_ref[...].astype(jnp.float32)                          # (N, C)
    y = jnp.minimum(jnp.maximum(y + 3.0, 0.0), 6.0) * (1.0 / 6.0)

    # Per-(batch, channel) scale, broadcast over the HW lanes (unmasked vst: HW % 128 == 0).
    o_ref[...] = (x * y[:, :, None]).astype(o_ref.dtype)


def se_block_forward(x_nchw, w1, b1, w2, b2):
    """SEBlock forward. x_nchw: (N, C, H, W); w1: (Cmid, C); w2: (C, Cmid)."""
    N, C, H, W = x_nchw.shape
    # F.avg_pool2d(x, kernel_size=H) is a *global* pool only when H == W.
    assert H == W, "SEBlock uses avg_pool2d(kernel_size=H); requires square spatial input"
    HW = H * W
    Cmid = w1.shape[0]
    assert w1.shape == (Cmid, C) and w2.shape == (C, Cmid)
    assert b1.shape == (Cmid,) and b2.shape == (C,)

    # Free layout plumbing only: no dtype casts, no data blow-up.
    x3 = x_nchw.reshape(N, C, HW)            # NCHW is contiguous -> free view, native dtype
    w1t = jnp.transpose(w1)                  # (C, Cmid)   tiny (Cmid*C elems)
    w2t = jnp.transpose(w2)                  # (Cmid, C)
    b1r = b1.reshape(1, Cmid)                # lane-dense bias
    b2r = b2.reshape(1, C)

    itemsize = jnp.dtype(x_nchw.dtype).itemsize
    flops = N * (2 * C * HW                  # pool reduce + final scale
                 + 2 * C * Cmid + Cmid       # squeeze fc + bias/relu
                 + 2 * Cmid * C + 5 * C)     # excite fc + bias + h_sigmoid
    bytes_accessed = (2 * x3.size * itemsize
                      + (w1.size + w2.size + Cmid + C) * jnp.dtype(w1.dtype).itemsize)

    out = pl.pallas_call(
        _se_kernel,
        out_shape=jax.ShapeDtypeStruct((N, C, HW), x_nchw.dtype),
        in_specs=[pl.BlockSpec(memory_space=pltpu.MemorySpace.VMEM) for _ in range(5)],
        out_specs=pl.BlockSpec(memory_space=pltpu.MemorySpace.VMEM),
        cost_estimate=pl.CostEstimate(
            flops=flops, transcendentals=0, bytes_accessed=bytes_accessed),
    )(x3, w1t, b1r, w2t, b2r)

    return out.reshape(N, C, H, W)


# ----------------------------------------------------------------------------
# pure-JAX reference for correctness check
# ----------------------------------------------------------------------------
def reference_forward(x, w1, b1, w2, b2):
    # global average pool (H == W case of avg_pool2d(kernel_size=H))
    y = jnp.mean(x, axis=(2, 3), keepdims=True)                        # (N, C, 1, 1)
    y = jnp.einsum("mc,ncij->nmij", w1, y) + b1.reshape(1, -1, 1, 1)   # 1x1 conv reduce
    y = jnp.maximum(y, 0.0)                                            # relu
    y = jnp.einsum("cm,nmij->ncij", w2, y) + b2.reshape(1, -1, 1, 1)   # 1x1 conv expand
    y = jnp.minimum(jnp.maximum(y + 3.0, 0.0), 6.0) / 6.0              # h_sigmoid
    return x * y


# ----------------------------------------------------------------------------
if __name__ == "__main__":
    # Module config: SEBlock(channel=4, reduction=4, bias=True,
    #                        act_func1='relu', act_func2='h_sigmoid', divisor=8)
    channel, reduction, divisor = 4, 4, 8
    num_mid = make_divisible(channel // reduction, divisor=divisor)    # -> 8

    key = jax.random.PRNGKey(0)
    ks = jax.random.split(key, 5)

    x = jax.random.normal(ks[0], (2, channel, 16, 16), jnp.float32)        # NCHW
    w1 = 0.3 * jax.random.normal(ks[1], (num_mid, channel), jnp.float32)   # reduce 1x1 conv
    b1 = 0.1 * jax.random.normal(ks[2], (num_mid,), jnp.float32)
    w2 = 0.3 * jax.random.normal(ks[3], (channel, num_mid), jnp.float32)   # expand 1x1 conv
    b2 = 0.1 * jax.random.normal(ks[4], (channel,), jnp.float32)

    out = se_block_forward(x, w1, b1, w2, b2)
    out = jax.block_until_ready(out)

    ref = reference_forward(x, w1, b1, w2, b2)
    assert out.shape == ref.shape == (2, channel, 16, 16)
    assert jnp.allclose(out, ref, rtol=1e-5, atol=1e-5), \
        f"max err {jnp.max(jnp.abs(out - ref))}"

    print("KERNEL_OK")
</pallas_src>

<mosaic_0001>
module attributes {stable_mosaic.version = 11 : i64} {
  func.func @_se_kernel(%arg0: memref<2x4x256xf32, #tpu.memory_space<vmem>>, %arg1: memref<4x8xf32, #tpu.memory_space<vmem>>, %arg2: memref<1x8xf32, #tpu.memory_space<vmem>>, %arg3: memref<8x4xf32, #tpu.memory_space<vmem>>, %arg4: memref<1x4xf32, #tpu.memory_space<vmem>>, %arg5: memref<2x4x256xf32, #tpu.memory_space<vmem>>) attributes {dimension_semantics = [], scalar_prefetch = 0 : i64, scratch_operands = 0 : i64, tpu.core_type = #tpu.core_type<tc>} {
    %c0 = arith.constant 0 : index
    %c0_0 = arith.constant 0 : index
    %c0_1 = arith.constant 0 : index
    %0 = vector.load %arg0[%c0, %c0_0, %c0_1] : memref<2x4x256xf32, #tpu.memory_space<vmem>>, vector<2x4x256xf32>
    %cst = arith.constant dense<0.000000e+00> : vector<2x4xf32>
    %1 = vector.multi_reduction <add>, %0, %cst [2] : vector<2x4x256xf32> to vector<2x4xf32>
    %cst_2 = arith.constant 2.560000e+02 : f32
    %2 = vector.broadcast %cst_2 : f32 to vector<2x4xf32>
    %3 = arith.divf %1, %2 : vector<2x4xf32>
    %c0_3 = arith.constant 0 : index
    %c0_4 = arith.constant 0 : index
    %4 = vector.load %arg1[%c0_3, %c0_4] : memref<4x8xf32, #tpu.memory_space<vmem>>, vector<4x8xf32>
    %cst_5 = arith.constant dense<0.000000e+00> : vector<2x8xf32>
    %5 = tpu.matmul %3, %4, %cst_5 {dimension_numbers = #tpu.dot_dimension_numbers<[1], [0], [0], [1], [0, 0, 1, 1], [], []>} : vector<2x4xf32>, vector<4x8xf32>, vector<2x8xf32> -> vector<2x8xf32>
    %c0_6 = arith.constant 0 : index
    %c0_7 = arith.constant 0 : index
    %6 = vector.load %arg2[%c0_6, %c0_7] : memref<1x8xf32, #tpu.memory_space<vmem>>, vector<1x8xf32>
    %7 = vector.broadcast %6 : vector<1x8xf32> to vector<2x8xf32>
    %8 = arith.addf %5, %7 : vector<2x8xf32>
    %cst_8 = arith.constant 0.000000e+00 : f32
    %9 = vector.broadcast %cst_8 : f32 to vector<2x8xf32>
    %10 = arith.maximumf %8, %9 : vector<2x8xf32>
    %c0_9 = arith.constant 0 : index
    %c0_10 = arith.constant 0 : index
    %11 = vector.load %arg3[%c0_9, %c0_10] : memref<8x4xf32, #tpu.memory_space<vmem>>, vector<8x4xf32>
    %cst_11 = arith.constant dense<0.000000e+00> : vector<2x4xf32>
    %12 = tpu.matmul %10, %11, %cst_11 {dimension_numbers = #tpu.dot_dimension_numbers<[1], [0], [0], [1], [0, 0, 1, 1], [], []>} : vector<2x8xf32>, vector<8x4xf32>, vector<2x4xf32> -> vector<2x4xf32>
    %c0_12 = arith.constant 0 : index
    %c0_13 = arith.constant 0 : index
    %13 = vector.load %arg4[%c0_12, %c0_13] : memref<1x4xf32, #tpu.memory_space<vmem>>, vector<1x4xf32>
    %14 = vector.broadcast %13 : vector<1x4xf32> to vector<2x4xf32>
    %15 = arith.addf %12, %14 : vector<2x4xf32>
    %cst_14 = arith.constant 3.000000e+00 : f32
    %16 = vector.broadcast %cst_14 : f32 to vector<2x4xf32>
    %17 = arith.addf %15, %16 : vector<2x4xf32>
    %cst_15 = arith.constant 0.000000e+00 : f32
    %18 = vector.broadcast %cst_15 : f32 to vector<2x4xf32>
    %19 = arith.maximumf %17, %18 : vector<2x4xf32>
    %cst_16 = arith.constant 6.000000e+00 : f32
    %20 = vector.broadcast %cst_16 : f32 to vector<2x4xf32>
    %21 = arith.minimumf %19, %20 : vector<2x4xf32>
    %cst_17 = arith.constant 0.166666672 : f32
    %22 = vector.broadcast %cst_17 : f32 to vector<2x4xf32>
    %23 = arith.mulf %21, %22 : vector<2x4xf32>
    %24 = vector.shape_cast %23 : vector<2x4xf32> to vector<2x4x1xf32>
    %25 = vector.broadcast %24 : vector<2x4x1xf32> to vector<2x4x256xf32>
    %26 = arith.mulf %0, %25 : vector<2x4x256xf32>
    %c0_18 = arith.constant 0 : index
    %c0_19 = arith.constant 0 : index
    %c0_20 = arith.constant 0 : index
    %27 = vector.load %arg5[%c0_18, %c0_19, %c0_20] : memref<2x4x256xf32, #tpu.memory_space<vmem>>, vector<2x4x256xf32>
    tpu.vector_store %arg5[%c0_18, %c0_19, %c0_20], %26 {strides = array<i32>} : memref<2x4x256xf32, #tpu.memory_space<vmem>>, vector<2x4x256xf32>,
    return
  }
}

</mosaic_0001>

<bundles_post_ra>
// kernel: tpu_custom_call.1
= control target key start
LH: loop header
LB: loop body
LE: loop exit
PB: predicated region body
PF: predicated region fallthrough
CT: control target
= control target key end

     0   :  { %10 = vsyncpa [#allocation3], 0  ;;  %s334_s0 = inlined_call_operand.hbm [shape: f32[2,4,256], index: 0, kind: input, shape index: {}]   ;;  %s335_s1 = inlined_call_operand.vmem [shape: f32[4,8], index: 1, kind: input, shape index: {}]   ;;  %s336_s2 = inlined_call_operand.vmem [shape: f32[1,8], index: 2, kind: input, shape index: {}]   ;;  %s337_s3 = inlined_call_operand.vmem [shape: f32[8,4], index: 3, kind: input, shape index: {}]   ;;  %s338_s4 = inlined_call_operand.vmem [shape: f32[1,4], index: 4, kind: input, shape index: {}]   ;;  %s339_s5 = inlined_call_operand.hbm [shape: f32[2,4,256], index: 5, kind: output, shape index: {}]  }
   0x1   :  { %11 = vsyncpa [#allocation4], 0  ;;  %s16_s20 = sshll.u32 %s334_s0, 4  ;;  %s261_s21 = smov [#allocation2]   ;;  %s17_s20 = int_to_ptr.hbm [resolvable:$true] %s16_s20 }
   0x2   :  { %s18_s22 = sshll.u32 %s261_s21, 4  ;;  %s262_s23 = smov 128   ;;  %s19_s22 = int_to_ptr.vmem [resolvable:$true] %s18_s22 }
   0x3   :  { %s263_s24 = smov 8  }
   0x4   :  { %24 = dma.hbm_to_vmem [thread:$0]  %s17_s20, 256, %s19_s22, [#allocation3], %s262_s23, %s262_s23, %s263_s24  }
   0x5   :  { %257 = dma.done.wait [#allocation3], 256  }
   0x6   :  { %258 = vsyncadd [#allocation3], 4294967040  ;;  %v303_v0 = vld [vmem:[#allocation2] sm:$0xff]  ;;  %v305_v1 = vld [vmem:[#allocation2 + $0x8] sm:$0xff]  ;;  %vm52_vm0 = vcmask 1043456   ;;  %v264_v12 = vmov 256.0   ;;  %v79_v20 = vlaneseq }
   0x7   :  { %41 = vst [vmem:[#allocation1] ss:$2 sm:$0xff] %v303_v0  ;;  %207 = vrcp.f32 %v264_v12  ;;  %v72_v13 = vld [vmem:[%s335_s1] sm:$0xf]  ;;  %vm83_vm2 = vcmask 1041409   ;;  %vm85_vm3 = vcmask 31744  }
   0x8   :  { %45 = vst [vmem:[#allocation1 + $0x10] ss:$2 sm:$0xff] %v305_v1  ;;  %194 = vmatpush.msk.msra.mxu0 %vm52_vm0, %v72_v13  ;;  %v80_v22 = vand.u32 127, %v79_v20  ;;  %v112_v29 = vld [vmem:[%s337_s3] sm:$0xff]  ;;  %vm117_vm4 = vcmask 64512   ;;  %v147_v34 = vshrl.u32 %v79_v20, 7 }
   0x9   :  { %136 = vmatpush.msra.mxu1 %v112_v29  ;;  %v205_v30 = vld [vmem:[%s336_s2] ss:$0 sm:$0xff]  ;;  %v265_v44 = vmov 839922192   ;;  %s266_s2 = smov [#allocation5]   ;;  %s181_s7 = sshll.u32 %s339_s5, 4  ;;  %s182_s7 = int_to_ptr.hbm [resolvable:$true] %s181_s7 }
   0xa   :  { %203 = vset.pattern.permute.xlu1 %v147_v34  ;;  %204 = vset.pattern.permute.xlu0 %v147_v34  ;;  %v206_v35 = vld [vmem:[%s338_s4] ss:$0 sm:$0xff]  ;;  %v162_v45 = vunpack.c.l.s4 %v265_v44  ;;  %s179_s3 = sshll.u32 %s266_s2, 4  ;;  %s180_s3 = int_to_ptr.vmem [resolvable:$true] %s179_s3 }
   0xc   :  { %v163_v46 = vunpack.c.0.s8 %v162_v45 }
   0xd   :  { %v208_v14 = vpop.eup %207 }
   0xe   :  { %v42_v2 = vld.sshfl [vmem:[#allocation1] sm:$0xff pattern:$0x75316420]  ;;  %v43_v3 = vld.sshfl [vmem:[#allocation1 + $0x8] sm:$0xff pattern:$0x75316420]  ;;  %vm68_vm1 = vweird.f32 %v208_v14 }
   0xf   :  { %v53_v4 = vsel %vm52_vm0, %v42_v2, 0.0  ;;  %v54_v5 = vsel %vm52_vm0, %v43_v3, 0.0  ;;  %v46_v7 = vld.sshfl [vmem:[#allocation1 + $0x10] sm:$0xff pattern:$0x75316420]  ;;  %v64_v15 = vmul.f32 256.0, %v208_v14 }
  0x10   :  { %v55_v6 = vadd.f32 %v54_v5, %v53_v4  ;;  %v47_v8 = vld.sshfl [vmem:[#allocation1 + $0x18] sm:$0xff pattern:$0x75316420]  ;;  %v58_v9 = vsel %vm52_vm0, %v46_v7, 0.0 }
  0x11   :  { %v59_v10 = vsel %vm52_vm0, %v47_v8, 0.0  ;;  %v65_v16 = vsub.f32 1.0, %v64_v15 }
  0x12   :  { %56 = vadd.xlane.f32.xlu0 %v55_v6  ;;  %v60_v11 = vadd.f32 %v59_v10, %v58_v9 }
  0x13   :  { %v66_v17 = vmul.f32 %v208_v14, %v65_v16 }
  0x15   :  { %v67_v18 = vadd.f32 %v208_v14, %v66_v17 }
  0x17   :  { %v69_v21 = vsel %vm68_vm1, %v208_v14, %v67_v18 }
  0x1a   :  { %61 = vadd.xlane.f32.xlu0 %v60_v11 }
  0x85   :  { %v57_v19 = vpop.xlane.xlu0 %56 }
  0x86   :  { %v70_v23 = vmul.f32 %v69_v21, %v57_v19 }
  0x88   :  { %v81_v26 = vperm.slane %v70_v23, %v80_v22 }
  0x8d   :  { %v62_v24 = vpop.xlane.xlu0 %61 }
  0x8e   :  { %v71_v25 = vmul.f32 %v69_v21, %v62_v24 }
  0x90   :  { %v82_v27 = vperm.slane %v71_v25, %v80_v22 }
  0x92   :  { %v84_v28 = vsel %vm83_vm2, %v82_v27, %v81_v26 }
  0x93   :  { %195 = vmatmul.msk.f32.vlgmr.msra.gmra.mxu0 %vm85_vm3, %v84_v28 }
 0x110   :  { %v108_v31 = vpop.f32.mrf.mxu0 }
 0x111   :  { %v109_v32 = vadd.f32 %v205_v30, %v108_v31 }
 0x113   :  { %v111_v33 = vmax.f32 %v109_v32, 0.0 }
 0x115   :  { %196 = vmatmul.msk.f32.vlgmr.msra.gmra.mxu1 %vm117_vm4, %v111_v33 }
 0x192   :  { %v138_v36 = vpop.f32.mrf.mxu1 }
 0x193   :  { %v139_v37 = vadd.f32 %v206_v35, %v138_v36 }
 0x195   :  { %v141_v38 = vadd.f32 3.0, %v139_v37 }
 0x197   :  { %v142_v39 = vmax.f32 %v141_v38, 0.0 }
 0x199   :  { %v143_v40 = vmin.f32 %v142_v39, 6.0 }
 0x19b   :  { %v144_v41 = vmul.f32 0.16666667, %v143_v40 }
 0x19d   :  { %v145_v42 = vperm.slane %v144_v41, 0  ;;  %v152_v43 = vperm.slane %v144_v41, 1 }
 0x19f   :  { %150 = vperm.xlu1 %203, %v145_v42  }
 0x1a7   :  { %157 = vperm.xlu1 %203, %v152_v43  }
 0x211   :  { %v151_v47 = vpop.permute.xlu1 %150 }
 0x212   :  { %v164_v48 = vperm.slane %v151_v47, %v163_v46 }
 0x214   :  { %v171_v49 = vmul.f32 %v164_v48, %v303_v0 }
 0x216   :  { %173 = vst [vmem:[#allocation5] sm:$0xff] %v171_v49 }
 0x219   :  { %v158_v50 = vpop.permute.xlu1 %157 }
 0x21a   :  { %v168_v51 = vperm.slane %v158_v50, %v163_v46 }
 0x21c   :  { %v172_v52 = vmul.f32 %v168_v51, %v305_v1 }
 0x21e   :  { %174 = vst [vmem:[#allocation5 + $0x8] sm:$0xff] %v172_v52 }
 0x21f   :  { %187 = dma.vmem_to_hbm [thread:$0]  %s180_s3, 256, %s182_s7, [#allocation4], %s262_s23, %s262_s23, %s263_s24  }
 0x220   :  { %259 = dma.done.wait [#allocation4], 256  }
 0x221   :  { %260 = vsyncadd [#allocation4], 4294967040 }
 0x222   :  { %192 = vsyncpa [#allocation3], 1 }
 0x223   :  { %193 = vsyncpa [#allocation4], 1 }

</bundles_post_ra>
